<compile_context>
chip_gen: v5e
topology: v5e:2x2
jax: 0.10.0
libtpu: 0.0.40
codegen_flags: <defaults>
</compile_context>

<pallas_src>
import jax
import jax.numpy as jnp
from jax import lax
from jax.experimental import pallas as pl
from jax.experimental.pallas import tpu as pltpu

_LANE = 128
_SUBLANE = 8


def _round_up(x, m):
    return (x + m - 1) // m * m


def _log_softmax_masked(logits, n_valid):
    """Row-wise log_softmax over the first `n_valid` (static) columns."""
    col = lax.broadcasted_iota(jnp.int32, logits.shape, dimension=1)
    masked = jnp.where(col < n_valid, logits, jnp.float32(-1e30))
    m = jnp.max(masked, axis=1, keepdims=True)
    s = masked - m
    lse = jnp.log(jnp.sum(jnp.exp(s), axis=1, keepdims=True))
    return s - lse


def _make_branch_kernel(num_branches, list_ind, layer_norm, n_class, inv_k):
    """Per-branch matmuls unrolled statically; accumulator stays in vregs."""

    def kernel(x_ref, w1_ref, b1_ref, w2_ref, b2_ref, o_ref):
        acc = None
        for k in range(num_branches):
            ind = list_ind[k]                      # static python int
            tmp = jnp.dot(x_ref[k], w1_ref[ind],
                          preferred_element_type=jnp.float32) + b1_ref[ind]
            if layer_norm:
                # F.normalize(tmp, p=2, dim=1) == tmp / max(||tmp||, 1e-12)
                sumsq = jnp.sum(tmp * tmp, axis=1, keepdims=True)
                tmp = tmp * lax.rsqrt(jnp.maximum(sumsq, 1e-24))
            acc = tmp if acc is None else acc + tmp
        final = jnp.maximum(acc * inv_k, 0.0)      # mean over branches + ReLU
        # dropout: inference no-op (see TODO above)
        logits = jnp.dot(final.astype(w2_ref.dtype), w2_ref[...],
                         preferred_element_type=jnp.float32) + b2_ref[...]
        o_ref[...] = _log_softmax_masked(logits, n_class)

    return kernel


def _make_fused_kernel(n_class, inv_k):
    """layer_norm=False: K branch matmuls fused into one contraction."""

    def kernel(x_ref, w1_ref, b1_ref, w2_ref, b2_ref, o_ref):
        acc = jnp.dot(x_ref[...], w1_ref[...],
                      preferred_element_type=jnp.float32) + b1_ref[...]
        final = jnp.maximum(acc * inv_k, 0.0)
        logits = jnp.dot(final.astype(w2_ref.dtype), w2_ref[...],
                         preferred_element_type=jnp.float32) + b2_ref[...]
        o_ref[...] = _log_softmax_masked(logits, n_class)

    return kernel


def classifier_forward(list_mat, layer_norm, list_ind, params):
    """JAX wrapper: pad/stack activations once, single Pallas kernel call."""
    K = len(list_mat)
    N = list_mat[0].shape[0]
    nfeat, nclass = params["nfeat"], params["nclass"]
    w1 = params["fc1_w_t"]          # [L, F_pad, H_pad] bf16 (pre-transposed)
    b1 = params["fc1_b_p"]          # [L, 1, H_pad]     f32
    w2 = params["fc2_w_t"]          # [H_pad, C_pad]    bf16
    b2 = params["fc2_b_p"]          # [1, C_pad]        f32
    F_pad = w1.shape[1]
    C_pad = w2.shape[1]
    N_pad = _round_up(N, _SUBLANE)
    inv_k = 1.0 / float(K)
    ind = tuple(int(i) for i in list_ind)

    vmem = pl.BlockSpec(memory_space=pltpu.MemorySpace.VMEM)
    out_shape = jax.ShapeDtypeStruct((N_pad, C_pad), jnp.float32)

    def _pad_branch(m):
        m = m.astype(jnp.bfloat16)
        return jnp.pad(m, ((0, N_pad - N), (0, F_pad - nfeat)))

    if layer_norm:
        x = jnp.stack([_pad_branch(m) for m in list_mat], axis=0)   # [K,N_pad,F_pad]
        kernel = _make_branch_kernel(K, ind, True, nclass, inv_k)
        out = pl.pallas_call(
            kernel, out_shape=out_shape,
            in_specs=[vmem, vmem, vmem, vmem, vmem], out_specs=vmem,
        )(x, w1, b1, w2, b2)
    else:
        # sum_k x_k @ W1_{ind_k} == concat_k(x_k) @ concat_k(W1_{ind_k})
        xcat = jnp.concatenate([_pad_branch(m) for m in list_mat], axis=1)  # [N_pad, K*F_pad]
        w1cat = jnp.concatenate([w1[i] for i in ind], axis=0)               # [K*F_pad, H_pad]
        b1sum = sum(b1[i] for i in ind)                                     # [1, H_pad]
        kernel = _make_fused_kernel(nclass, inv_k)
        out = pl.pallas_call(
            kernel, out_shape=out_shape,
            in_specs=[vmem, vmem, vmem, vmem, vmem], out_specs=vmem,
        )(xcat, w1cat, b1sum, w2, b2)

    return out[:N, :nclass]


# ---------------------------------------------------------------------------
# Parameter construction (PyTorch Linear shapes: W [out, in]) + one-time prep.
# ---------------------------------------------------------------------------
def init_params(key, nfeat, nlayers, nhidden, nclass):
    keys = jax.random.split(key, 2 * nlayers + 2)
    fc1_w = [jax.random.normal(keys[2 * i], (nhidden, nfeat), jnp.float32)
             * (1.0 / jnp.sqrt(nfeat)) for i in range(nlayers)]
    fc1_b = [jax.random.normal(keys[2 * i + 1], (nhidden,), jnp.float32) * 0.01
             for i in range(nlayers)]
    fc2_w = jax.random.normal(keys[-2], (nclass, nhidden), jnp.float32) \
        * (1.0 / jnp.sqrt(nhidden))
    fc2_b = jax.random.normal(keys[-1], (nclass,), jnp.float32) * 0.01
    return {"fc1_w": fc1_w, "fc1_b": fc1_b, "fc2_w": fc2_w, "fc2_b": fc2_b}


def prepare_params(raw, nfeat, nhidden, nclass):
    """Pre-transpose + zero-pad to lane-dense shapes once (not per call)."""
    F_pad = _round_up(nfeat, _LANE)
    H_pad = _round_up(nhidden, _LANE)
    C_pad = _round_up(nclass, _LANE)
    w1 = jnp.stack([w.T for w in raw["fc1_w"]], axis=0)            # [L, F, H]
    w1 = jnp.pad(w1, ((0, 0), (0, F_pad - nfeat), (0, H_pad - nhidden)))
    b1 = jnp.stack(raw["fc1_b"], axis=0)[:, None, :]               # [L, 1, H]
    b1 = jnp.pad(b1, ((0, 0), (0, 0), (0, H_pad - nhidden)))
    w2 = jnp.pad(raw["fc2_w"].T, ((0, H_pad - nhidden), (0, C_pad - nclass)))
    b2 = jnp.pad(raw["fc2_b"][None, :], ((0, 0), (0, C_pad - nclass)))
    return {
        "fc1_w_t": w1.astype(jnp.bfloat16),
        "fc1_b_p": b1.astype(jnp.float32),
        "fc2_w_t": w2.astype(jnp.bfloat16),
        "fc2_b_p": b2.astype(jnp.float32),
        "nfeat": nfeat, "nhidden": nhidden, "nclass": nclass,
    }


def classifier_reference(list_mat, layer_norm, list_ind, raw):
    """Pure-JAX f32 reference mirroring the PyTorch forward (eval mode)."""
    outs = []
    for b_idx, ind_m in enumerate(list_ind):
        t = list_mat[b_idx] @ raw["fc1_w"][ind_m].T + raw["fc1_b"][ind_m]
        if layer_norm:
            nrm = jnp.sqrt(jnp.sum(t * t, axis=1, keepdims=True))
            t = t / jnp.maximum(nrm, 1e-12)
        outs.append(t)
    final = sum(outs) / len(list_mat)
    out = jnp.maximum(final, 0.0)
    out = out @ raw["fc2_w"].T + raw["fc2_b"]
    return jax.nn.log_softmax(out, axis=1)


if __name__ == "__main__":
    # small shapes consistent with the module
    nfeat, nlayers, nhidden, nclass = 16, 3, 32, 8
    N = 8                      # rows per branch matrix
    list_ind = [0, 2, 1]       # which fc1 layer each branch uses
    K = len(list_ind)

    key = jax.random.PRNGKey(0)
    pkey, xkey = jax.random.split(key)
    raw = init_params(pkey, nfeat, nlayers, nhidden, nclass)
    params = prepare_params(raw, nfeat, nhidden, nclass)

    xkeys = jax.random.split(xkey, K)
    list_mat = [jax.random.normal(xkeys[i], (N, nfeat), jnp.float32)
                for i in range(K)]

    for layer_norm in (True, False):
        out = classifier_forward(list_mat, layer_norm, list_ind, params)
        out = jax.block_until_ready(out)
        assert out.shape == (N, nclass)
        # rows of log_softmax must sum (in prob space) to ~1
        assert jnp.allclose(jnp.sum(jnp.exp(out), axis=1), 1.0, atol=1e-4)
        # match the f32 reference (bf16 MXU inputs -> loose tolerance)
        ref = classifier_reference(list_mat, layer_norm, list_ind, raw)
        assert float(jnp.max(jnp.abs(out - ref))) < 1e-1

    print("KERNEL_OK")
</pallas_src>

<mosaic_0001>
module attributes {stable_mosaic.version = 11 : i64} {
  func.func @kernel(%arg0: memref<3x8x128xbf16, #tpu.memory_space<vmem>>, %arg1: memref<3x128x128xbf16, #tpu.memory_space<vmem>>, %arg2: memref<3x1x128xf32, #tpu.memory_space<vmem>>, %arg3: memref<128x128xbf16, #tpu.memory_space<vmem>>, %arg4: memref<1x128xf32, #tpu.memory_space<vmem>>, %arg5: memref<8x128xf32, #tpu.memory_space<vmem>>) attributes {dimension_semantics = [], scalar_prefetch = 0 : i64, scratch_operands = 0 : i64, tpu.core_type = #tpu.core_type<tc>} {
    %c0 = arith.constant 0 : index
    %c0_0 = arith.constant 0 : index
    %c0_1 = arith.constant 0 : index
    %0 = vector.load %arg0[%c0, %c0_0, %c0_1] : memref<3x8x128xbf16, #tpu.memory_space<vmem>>, vector<1x8x128xbf16>
    %1 = vector.shape_cast %0 : vector<1x8x128xbf16> to vector<8x128xbf16>
    %c0_2 = arith.constant 0 : index
    %c0_3 = arith.constant 0 : index
    %c0_4 = arith.constant 0 : index
    %2 = vector.load %arg1[%c0_2, %c0_3, %c0_4] : memref<3x128x128xbf16, #tpu.memory_space<vmem>>, vector<1x128x128xbf16>
    %3 = vector.shape_cast %2 : vector<1x128x128xbf16> to vector<128x128xbf16>
    %cst = arith.constant dense<0.000000e+00> : vector<8x128xf32>
    %4 = tpu.matmul %1, %3, %cst {dimension_numbers = #tpu.dot_dimension_numbers<[1], [0], [0], [1], [0, 0, 1, 1], [], []>} : vector<8x128xbf16>, vector<128x128xbf16>, vector<8x128xf32> -> vector<8x128xf32>
    %c0_5 = arith.constant 0 : index
    %c0_6 = arith.constant 0 : index
    %c0_7 = arith.constant 0 : index
    %5 = vector.load %arg2[%c0_5, %c0_6, %c0_7] : memref<3x1x128xf32, #tpu.memory_space<vmem>>, vector<1x1x128xf32>
    %6 = vector.shape_cast %5 : vector<1x1x128xf32> to vector<1x128xf32>
    %7 = vector.broadcast %6 : vector<1x128xf32> to vector<8x128xf32>
    %8 = arith.addf %4, %7 : vector<8x128xf32>
    %9 = arith.mulf %8, %8 : vector<8x128xf32>
    %cst_8 = arith.constant dense<0.000000e+00> : vector<8xf32>
    %10 = vector.multi_reduction <add>, %9, %cst_8 [1] : vector<8x128xf32> to vector<8xf32>
    %11 = vector.shape_cast %10 : vector<8xf32> to vector<8x1xf32>
    %cst_9 = arith.constant 1.000000e-24 : f32
    %12 = vector.broadcast %cst_9 : f32 to vector<8x1xf32>
    %13 = arith.maximumf %11, %12 : vector<8x1xf32>
    %14 = math.rsqrt %13 : vector<8x1xf32>
    %15 = vector.broadcast %14 : vector<8x1xf32> to vector<8x128xf32>
    %16 = arith.mulf %8, %15 : vector<8x128xf32>
    %c1 = arith.constant 1 : index
    %c0_10 = arith.constant 0 : index
    %c0_11 = arith.constant 0 : index
    %17 = vector.load %arg0[%c1, %c0_10, %c0_11] : memref<3x8x128xbf16, #tpu.memory_space<vmem>>, vector<1x8x128xbf16>
    %18 = vector.shape_cast %17 : vector<1x8x128xbf16> to vector<8x128xbf16>
    %c2 = arith.constant 2 : index
    %c0_12 = arith.constant 0 : index
    %c0_13 = arith.constant 0 : index
    %19 = vector.load %arg1[%c2, %c0_12, %c0_13] : memref<3x128x128xbf16, #tpu.memory_space<vmem>>, vector<1x128x128xbf16>
    %20 = vector.shape_cast %19 : vector<1x128x128xbf16> to vector<128x128xbf16>
    %cst_14 = arith.constant dense<0.000000e+00> : vector<8x128xf32>
    %21 = tpu.matmul %18, %20, %cst_14 {dimension_numbers = #tpu.dot_dimension_numbers<[1], [0], [0], [1], [0, 0, 1, 1], [], []>} : vector<8x128xbf16>, vector<128x128xbf16>, vector<8x128xf32> -> vector<8x128xf32>
    %c2_15 = arith.constant 2 : index
    %c0_16 = arith.constant 0 : index
    %c0_17 = arith.constant 0 : index
    %22 = vector.load %arg2[%c2_15, %c0_16, %c0_17] : memref<3x1x128xf32, #tpu.memory_space<vmem>>, vector<1x1x128xf32>
    %23 = vector.shape_cast %22 : vector<1x1x128xf32> to vector<1x128xf32>
    %24 = vector.broadcast %23 : vector<1x128xf32> to vector<8x128xf32>
    %25 = arith.addf %21, %24 : vector<8x128xf32>
    %26 = arith.mulf %25, %25 : vector<8x128xf32>
    %cst_18 = arith.constant dense<0.000000e+00> : vector<8xf32>
    %27 = vector.multi_reduction <add>, %26, %cst_18 [1] : vector<8x128xf32> to vector<8xf32>
    %28 = vector.shape_cast %27 : vector<8xf32> to vector<8x1xf32>
    %cst_19 = arith.constant 1.000000e-24 : f32
    %29 = vector.broadcast %cst_19 : f32 to vector<8x1xf32>
    %30 = arith.maximumf %28, %29 : vector<8x1xf32>
    %31 = math.rsqrt %30 : vector<8x1xf32>
    %32 = vector.broadcast %31 : vector<8x1xf32> to vector<8x128xf32>
    %33 = arith.mulf %25, %32 : vector<8x128xf32>
    %34 = arith.addf %16, %33 : vector<8x128xf32>
    %c2_20 = arith.constant 2 : index
    %c0_21 = arith.constant 0 : index
    %c0_22 = arith.constant 0 : index
    %35 = vector.load %arg0[%c2_20, %c0_21, %c0_22] : memref<3x8x128xbf16, #tpu.memory_space<vmem>>, vector<1x8x128xbf16>
    %36 = vector.shape_cast %35 : vector<1x8x128xbf16> to vector<8x128xbf16>
    %c1_23 = arith.constant 1 : index
    %c0_24 = arith.constant 0 : index
    %c0_25 = arith.constant 0 : index
    %37 = vector.load %arg1[%c1_23, %c0_24, %c0_25] : memref<3x128x128xbf16, #tpu.memory_space<vmem>>, vector<1x128x128xbf16>
    %38 = vector.shape_cast %37 : vector<1x128x128xbf16> to vector<128x128xbf16>
    %cst_26 = arith.constant dense<0.000000e+00> : vector<8x128xf32>
    %39 = tpu.matmul %36, %38, %cst_26 {dimension_numbers = #tpu.dot_dimension_numbers<[1], [0], [0], [1], [0, 0, 1, 1], [], []>} : vector<8x128xbf16>, vector<128x128xbf16>, vector<8x128xf32> -> vector<8x128xf32>
    %c1_27 = arith.constant 1 : index
    %c0_28 = arith.constant 0 : index
    %c0_29 = arith.constant 0 : index
    %40 = vector.load %arg2[%c1_27, %c0_28, %c0_29] : memref<3x1x128xf32, #tpu.memory_space<vmem>>, vector<1x1x128xf32>
    %41 = vector.shape_cast %40 : vector<1x1x128xf32> to vector<1x128xf32>
    %42 = vector.broadcast %41 : vector<1x128xf32> to vector<8x128xf32>
    %43 = arith.addf %39, %42 : vector<8x128xf32>
    %44 = arith.mulf %43, %43 : vector<8x128xf32>
    %cst_30 = arith.constant dense<0.000000e+00> : vector<8xf32>
    %45 = vector.multi_reduction <add>, %44, %cst_30 [1] : vector<8x128xf32> to vector<8xf32>
    %46 = vector.shape_cast %45 : vector<8xf32> to vector<8x1xf32>
    %cst_31 = arith.constant 1.000000e-24 : f32
    %47 = vector.broadcast %cst_31 : f32 to vector<8x1xf32>
    %48 = arith.maximumf %46, %47 : vector<8x1xf32>
    %49 = math.rsqrt %48 : vector<8x1xf32>
    %50 = vector.broadcast %49 : vector<8x1xf32> to vector<8x128xf32>
    %51 = arith.mulf %43, %50 : vector<8x128xf32>
    %52 = arith.addf %34, %51 : vector<8x128xf32>
    %cst_32 = arith.constant 0.333333343 : f32
    %53 = vector.broadcast %cst_32 : f32 to vector<8x128xf32>
    %54 = arith.mulf %52, %53 : vector<8x128xf32>
    %cst_33 = arith.constant 0.000000e+00 : f32
    %55 = vector.broadcast %cst_33 : f32 to vector<8x128xf32>
    %56 = arith.maximumf %54, %55 : vector<8x128xf32>
    %57 = arith.truncf %56 : vector<8x128xf32> to vector<8x128xbf16>
    %c0_34 = arith.constant 0 : index
    %c0_35 = arith.constant 0 : index
    %58 = vector.load %arg3[%c0_34, %c0_35] : memref<128x128xbf16, #tpu.memory_space<vmem>>, vector<128x128xbf16>
    %cst_36 = arith.constant dense<0.000000e+00> : vector<8x128xf32>
    %59 = tpu.matmul %57, %58, %cst_36 {dimension_numbers = #tpu.dot_dimension_numbers<[1], [0], [0], [1], [0, 0, 1, 1], [], []>} : vector<8x128xbf16>, vector<128x128xbf16>, vector<8x128xf32> -> vector<8x128xf32>
    %c0_37 = arith.constant 0 : index
    %c0_38 = arith.constant 0 : index
    %60 = vector.load %arg4[%c0_37, %c0_38] : memref<1x128xf32, #tpu.memory_space<vmem>>, vector<1x128xf32>
    %61 = vector.broadcast %60 : vector<1x128xf32> to vector<8x128xf32>
    %62 = arith.addf %59, %61 : vector<8x128xf32>
    %63 = tpu.iota {dimensions = array<i32: 1>} : vector<8x128xi32>
    %c8_i32 = arith.constant 8 : i32
    %64 = vector.broadcast %c8_i32 : i32 to vector<8x128xi32>
    %65 = arith.cmpi slt, %63, %64 : vector<8x128xi32>
    %cst_39 = arith.constant -1.000000e+30 : f32
    %66 = vector.broadcast %cst_39 : f32 to vector<8x128xf32>
    %67 = arith.select %65, %62, %66 : vector<8x128xi1>, vector<8x128xf32>
    %cst_40 = arith.constant dense<0xFF800000> : vector<8xf32>
    %68 = vector.multi_reduction <maximumf>, %67, %cst_40 [1] : vector<8x128xf32> to vector<8xf32>
    %69 = vector.shape_cast %68 : vector<8xf32> to vector<8x1xf32>
    %70 = vector.broadcast %69 : vector<8x1xf32> to vector<8x128xf32>
    %71 = arith.subf %67, %70 : vector<8x128xf32>
    %72 = math.exp %71 : vector<8x128xf32>
    %cst_41 = arith.constant dense<0.000000e+00> : vector<8xf32>
    %73 = vector.multi_reduction <add>, %72, %cst_41 [1] : vector<8x128xf32> to vector<8xf32>
    %74 = vector.shape_cast %73 : vector<8xf32> to vector<8x1xf32>
    %75 = math.log %74 : vector<8x1xf32>
    %76 = vector.broadcast %75 : vector<8x1xf32> to vector<8x128xf32>
    %77 = arith.subf %71, %76 : vector<8x128xf32>
    %c0_42 = arith.constant 0 : index
    %c0_43 = arith.constant 0 : index
    %78 = vector.load %arg5[%c0_42, %c0_43] : memref<8x128xf32, #tpu.memory_space<vmem>>, vector<8x128xf32>
    tpu.vector_store %arg5[%c0_42, %c0_43], %77 {strides = array<i32>} : memref<8x128xf32, #tpu.memory_space<vmem>>, vector<8x128xf32>,
    return
  }
}

</mosaic_0001>

<bundles_post_ra>
// kernel: tpu_custom_call.1
= control target key start
LH: loop header
LB: loop body
LE: loop exit
PB: predicated region body
PF: predicated region fallthrough
CT: control target
= control target key end

     0   :  { %10 = vsyncpa [#allocation3], 0  ;;  %s884_s0 = inlined_call_operand.hbm [shape: bf16[3,8,128], index: 0, kind: input, shape index: {}]   ;;  %s885_s1 = inlined_call_operand.hbm [shape: bf16[3,128,128], index: 1, kind: input, shape index: {}]   ;;  %s886_s2 = inlined_call_operand.hbm [shape: f32[3,1,128], index: 2, kind: input, shape index: {}]   ;;  %s887_s3 = inlined_call_operand.hbm [shape: bf16[128,128], index: 3, kind: input, shape index: {}]   ;;  %s888_s4 = inlined_call_operand.vmem [shape: f32[1,128], index: 4, kind: input, shape index: {}]   ;;  %s889_s5 = inlined_call_operand.hbm [shape: f32[8,128], index: 5, kind: output, shape index: {}]  }
   0x1   :  { %11 = vsyncpa [#allocation6], 0 }
   0x2   :  { %12 = vsyncpa [#allocation9], 0 }
   0x3   :  { %13 = vsyncpa [#allocation4], 0  ;;  %s31_s20 = sshll.u32 %s885_s1, 4  ;;  %s812_s21 = smov [#allocation5]   ;;  %s32_s20 = int_to_ptr.hbm [resolvable:$true] %s31_s20 }
   0x4   :  { %s33_s22 = sshll.u32 %s812_s21, 4  ;;  %s18_s25 = sshll.u32 %s884_s0, 4  ;;  %s34_s22 = int_to_ptr.vmem [resolvable:$true] %s33_s22  ;;  %s19_s25 = int_to_ptr.hbm [resolvable:$true] %s18_s25 }
   0x5   :  { %s813_s26 = smov 64   ;;  %s814_s27 = smov 4  }
   0x6   :  { %39 = dma.hbm_to_vmem [thread:$0]  %s32_s20, 3072, %s34_s22, [#allocation6], %s813_s26, %s813_s26, %s814_s27  }
   0x7   :  { %s815_s28 = smov [#allocation2]   ;;  %s44_s7 = sshll.u32 %s886_s2, 4  ;;  %s45_s7 = int_to_ptr.hbm [resolvable:$true] %s44_s7 }
   0x8   :  { %s20_s29 = sshll.u32 %s815_s28, 4  ;;  %s816_s1 = smov [#allocation7]   ;;  %s21_s29 = int_to_ptr.vmem [resolvable:$true] %s20_s29 }
   0x9   :  { %26 = dma.hbm_to_vmem [thread:$0]  %s19_s25, 192, %s21_s29, [#allocation3], %s813_s26, %s813_s26, %s814_s27  }
   0xa   :  { %s46_s8 = sshll.u32 %s816_s1, 4  ;;  %s57_s0 = sshll.u32 %s887_s3, 4  ;;  %s47_s8 = int_to_ptr.vmem [resolvable:$true] %s46_s8  ;;  %s58_s0 = int_to_ptr.hbm [resolvable:$true] %s57_s0 }
   0xb   :  { %s817_s11 = smov 16   ;;  %s818_s12 = smov 1  }
   0xc   :  { %52 = dma.hbm_to_vmem [thread:$0]  %s45_s7, 48, %s47_s8, [#allocation6], %s817_s11, %s817_s11, %s818_s12  }
   0xd   :  { %s819_s13 = smov [#allocation8]  }
   0xe   :  { %s59_s14 = sshll.u32 %s819_s13, 4  ;;  %s60_s14 = int_to_ptr.vmem [resolvable:$true] %s59_s14 }
   0xf   :  { %65 = dma.hbm_to_vmem [thread:$0]  %s58_s0, 1024, %s60_s14, [#allocation9], %s813_s26, %s813_s26, %s814_s27  }
  0x10   :  { %804 = dma.done.wait [#allocation3], 192  }
  0x11   :  { %805 = vsyncadd [#allocation3], 4294967104 }
  0x12   :  { %806 = dma.done.wait [#allocation6], 3120  }
  0x13   :  { %807 = vsyncadd [#allocation6], 4294964176 }
  0x14   :  { %808 = dma.done.wait [#allocation9], 1024  }
  0x15   :  { %809 = vsyncadd [#allocation9], 4294966272  ;;  %v636_v0 = vld [vmem:[#allocation5 + $0x38] sm:$0xff]  ;;  %v635_v3 = vld [vmem:[#allocation5 + $0x30] sm:$0xff]  ;;  %s820_s15 = smov [#allocation10]  }
  0x16   :  { %v644_v1 = vld [vmem:[#allocation5 + $0xb8] sm:$0xff]  ;;  %153 = vmatpush.bf16.msra.mxu0 %v636_v0  ;;  %v643_v4 = vld [vmem:[#allocation5 + $0xb0] sm:$0xff]  ;;  %v634_v6 = vld [vmem:[#allocation5 + $0x28] sm:$0xff]  ;;  %s487_s16 = sshll.u32 %s820_s15, 4  ;;  %s488_s16 = int_to_ptr.vmem [resolvable:$true] %s487_s16 }
  0x17   :  { %v652_v2 = vld [vmem:[#allocation5 + $0x78] sm:$0xff]  ;;  %253 = vmatpush.bf16.msra.mxu1 %v644_v1  ;;  %v651_v5 = vld [vmem:[#allocation5 + $0x70] sm:$0xff]  ;;  %v642_v7 = vld [vmem:[#allocation5 + $0xa8] sm:$0xff] }
  0x18   :  { %354 = vmatpush.bf16.msra.mxu2 %v652_v2  ;;  %v650_v8 = vld [vmem:[#allocation5 + $0x68] sm:$0xff]  ;;  %v633_v9 = vld [vmem:[#allocation5 + $0x20] sm:$0xff]  ;;  %v632_v12 = vld [vmem:[#allocation5 + $0x18] sm:$0xff] }
  0x19   :  { %v641_v10 = vld [vmem:[#allocation5 + $0xa0] sm:$0xff]  ;;  %v640_v13 = vld [vmem:[#allocation5 + $0x98] sm:$0xff]  ;;  %v631_v15 = vld [vmem:[#allocation5 + $0x10] sm:$0xff] }
  0x1a   :  { %154 = vmatpush.bf16.msra.mxu0 %v635_v3  ;;  %v649_v11 = vld [vmem:[#allocation5 + $0x60] sm:$0xff]  ;;  %v648_v14 = vld [vmem:[#allocation5 + $0x58] sm:$0xff]  ;;  %v639_v16 = vld [vmem:[#allocation5 + $0x90] sm:$0xff] }
  0x1b   :  { %254 = vmatpush.bf16.msra.mxu1 %v643_v4  ;;  %v647_v17 = vld [vmem:[#allocation5 + $0x50] sm:$0xff]  ;;  %v630_v18 = vld [vmem:[#allocation5 + $0x8] sm:$0xff]  ;;  %v629_v21 = vld [vmem:[#allocation5] sm:$0xff] }
  0x1c   :  { %355 = vmatpush.bf16.msra.mxu2 %v651_v5  ;;  %v638_v19 = vld [vmem:[#allocation5 + $0x88] sm:$0xff]  ;;  %v637_v22 = vld [vmem:[#allocation5 + $0x80] sm:$0xff]  ;;  %v84_v24 = vld [vmem:[#allocation2] sm:$0xf] }
  0x1d   :  { %v646_v20 = vld [vmem:[#allocation5 + $0x48] sm:$0xff]  ;;  %v645_v23 = vld [vmem:[#allocation5 + $0x40] sm:$0xff]  ;;  %v182_v25 = vld [vmem:[#allocation2 + $0x4] sm:$0xf] }
  0x1e   :  { %155 = vmatpush.bf16.msra.mxu0 %v634_v6  ;;  %v283_v26 = vld [vmem:[#allocation2 + $0x8] sm:$0xf]  ;;  %v670_v27 = vld [vmem:[#allocation7] ss:$0 sm:$0xff]  ;;  %v671_v31 = vld [vmem:[#allocation7 + $0x2] ss:$0 sm:$0xff] }
  0x1f   :  { %255 = vmatpush.bf16.msra.mxu1 %v642_v7  ;;  %v672_v33 = vld [vmem:[#allocation7 + $0x1] ss:$0 sm:$0xff]  ;;  %v659_v43 = vld [vmem:[#allocation8 + $0x30] sm:$0xff]  ;;  %v658_v44 = vld [vmem:[#allocation8 + $0x28] sm:$0xff] }
  0x20   :  { %356 = vmatpush.bf16.msra.mxu2 %v650_v8  ;;  %v660_v42 = vld [vmem:[#allocation8 + $0x38] sm:$0xff]  ;;  %v657_v45 = vld [vmem:[#allocation8 + $0x20] sm:$0xff]  ;;  %v655_v47 = vld [vmem:[#allocation8 + $0x10] sm:$0xff] }
  0x21   :  { %454 = vmatpush.bf16.msra.mxu3 %v660_v42  ;;  %v656_v46 = vld [vmem:[#allocation8 + $0x18] sm:$0xff]  ;;  %v654_v48 = vld [vmem:[#allocation8 + $0x8] sm:$0xff]  ;;  %v653_v51 = vld [vmem:[#allocation8] sm:$0xff] }
  0x22   :  { %156 = vmatpush.bf16.msra.mxu0 %v633_v9 }
  0x23   :  { %256 = vmatpush.bf16.msra.mxu1 %v641_v10 }
  0x24   :  { %357 = vmatpush.bf16.msra.mxu2 %v649_v11 }
  0x25   :  { %455 = vmatpush.bf16.msra.mxu3 %v659_v43 }
  0x26   :  { %157 = vmatpush.bf16.msra.mxu0 %v632_v12 }
  0x27   :  { %257 = vmatpush.bf16.msra.mxu1 %v640_v13 }
  0x28   :  { %358 = vmatpush.bf16.msra.mxu2 %v648_v14 }
  0x29   :  { %456 = vmatpush.bf16.msra.mxu3 %v658_v44 }
  0x2a   :  { %158 = vmatpush.bf16.msra.mxu0 %v631_v15 }
  0x2b   :  { %258 = vmatpush.bf16.msra.mxu1 %v639_v16 }
  0x2c   :  { %359 = vmatpush.bf16.msra.mxu2 %v647_v17 }
  0x2d   :  { %457 = vmatpush.bf16.msra.mxu3 %v657_v45 }
  0x2e   :  { %159 = vmatpush.bf16.msra.mxu0 %v630_v18 }
  0x2f   :  { %259 = vmatpush.bf16.msra.mxu1 %v638_v19 }
  0x30   :  { %360 = vmatpush.bf16.msra.mxu2 %v646_v20 }
  0x31   :  { %458 = vmatpush.bf16.msra.mxu3 %v656_v46 }
  0x32   :  { %160 = vmatpush.bf16.msra.mxu0 %v629_v21  ;;  %v467_v21 = vlaneseq }
  0x33   :  { %260 = vmatpush.bf16.msra.mxu1 %v637_v22 }
  0x34   :  { %361 = vmatpush.bf16.msra.mxu2 %v645_v23  ;;  %v468_v22 = vand.u32 127, %v467_v21  ;;  %v673_v23 = vld [vmem:[%s888_s4] ss:$0 sm:$0xff]  ;;  %s489_s4 = sshll.u32 %s889_s5, 4  ;;  %s490_s4 = int_to_ptr.hbm [resolvable:$true] %s489_s4 }
  0x35   :  { %161 = vmatmul.bf16.vlgmr.msra.gmra.mxu0 %v84_v24  ;;  %459 = vmatpush.bf16.msra.mxu3 %v655_v47 }
  0x36   :  { %261 = vmatmul.bf16.vlgmr.msra.gmra.mxu1 %v182_v25  ;;  %vm469_vm9 = vcmp.lt.s32.totalorder %v468_v22, 8 }
  0x37   :  { %362 = vmatmul.bf16.vlgmr.msra.gmra.mxu2 %v283_v26 }
  0x39   :  { %460 = vmatpush.bf16.msra.mxu3 %v654_v48 }
  0x3d   :  { %461 = vmatpush.bf16.msra.mxu3 %v653_v51 }
  0xb2   :  { %v162_v28 = vpop.f32.mrf.mxu0 }
  0xb3   :  { %v262_v29 = vpop.f32.mrf.mxu1  ;;  %v863_v30 = vadd.f32 %v670_v27, %v162_v28 }
  0xb4   :  { %v867_v34 = vadd.f32 %v671_v31, %v262_v29 }
  0xb5   :  { %v166_v32 = vmul.f32 %v863_v30, %v863_v30 }
  0xb6   :  { %v266_v39 = vmul.f32 %v867_v34, %v867_v34 }
  0xb7   :  { %167 = vadd.xlane.f32.xlu0 %v166_v32 }
  0xba   :  { %v363_v35 = vpop.f32.mrf.mxu2  ;;  %v164_v37 = vpop.f32.mrf.mxu0 }
  0xbb   :  { %v869_v36 = vadd.f32 %v672_v33, %v363_v35  ;;  %v264_v38 = vpop.f32.mrf.mxu1 }
  0xbd   :  { %v367_v40 = vmul.f32 %v869_v36, %v869_v36 }
  0xbf   :  { %368 = vadd.xlane.f32.xlu1 %v367_v40  ;;  %267 = vadd.xlane.f32.xlu0 %v266_v39 }
  0xc2   :  { %v365_v41 = vpop.f32.mrf.mxu2 }
 0x12a   :  { %v168_v49 = vpop.xlane.xlu0 %167 }
 0x12b   :  { %v169_v50 = vmax.f32 %v168_v49, 1e-24 }
 0x12d   :  { %674 = vrsqrt.f32 %v169_v50  ;;  %vm176_vm2 = vweird.f32 %v169_v50 }
 0x132   :  { %v369_v52 = vpop.xlane.xlu1 %368  ;;  %v268_v54 = vpop.xlane.xlu0 %267 }
 0x133   :  { %v370_v53 = vmax.f32 %v369_v52, 1e-24  ;;  %v675_v55 = vpop.eup %674  ;;  %v269_v56 = vmax.f32 %v268_v54, 1e-24 }
 0x134   :  { %v171_v57 = vmul.f32 %v675_v55, %v169_v50  ;;  %vm177_vm0 = vweird.f32 %v675_v55 }
 0x135   :  { %676 = vrsqrt.f32 %v370_v53  ;;  %vm178_vm4 = vmor %vm176_vm2, %vm177_vm0  ;;  %vm377_vm5 = vweird.f32 %v370_v53  ;;  %vm276_vm7 = vweird.f32 %v269_v56 }
 0x136   :  { %678 = vrsqrt.f32 %v269_v56  ;;  %v172_v58 = vmul.f32 %v675_v55, %v171_v57 }
 0x138   :  { %v173_v59 = vmul.f32 0.5, %v172_v58 }
 0x13a   :  { %v174_v63 = vsub.f32 1.5, %v173_v59 }
 0x13b   :  { %v677_v60 = vpop.eup %676 }
 0x13c   :  { %v679_v61 = vpop.eup %678  ;;  %v372_v62 = vmul.f32 %v677_v60, %v370_v53  ;;  %v175_v4 = vmul.f32 %v675_v55, %v174_v63  ;;  %vm378_vm1 = vweird.f32 %v677_v60 }
 0x13d   :  { %v271_v0 = vmul.f32 %v679_v61, %v269_v56  ;;  %vm277_vm3 = vweird.f32 %v679_v61  ;;  %vm379_vm6 = vmor %vm377_vm5, %vm378_vm1 }
 0x13e   :  { %v373_v1 = vmul.f32 %v677_v60, %v372_v62  ;;  %v179_v10 = vsel %vm178_vm4, %v675_v55, %v175_v4  ;;  %vm278_vm8 = vmor %vm276_vm7, %vm277_vm3 }
 0x13f   :  { %v272_v2 = vmul.f32 %v679_v61, %v271_v0  ;;  %v180_v13 = vmul.f32 %v179_v10, %v863_v30 }
 0x140   :  { %v374_v3 = vmul.f32 0.5, %v373_v1 }
 0x141   :  { %v273_v5 = vmul.f32 0.5, %v272_v2 }
 0x142   :  { %v375_v6 = vsub.f32 1.5, %v374_v3 }
 0x143   :  { %v274_v7 = vsub.f32 1.5, %v273_v5 }
 0x144   :  { %v376_v8 = vmul.f32 %v677_v60, %v375_v6 }
 0x145   :  { %v275_v9 = vmul.f32 %v679_v61, %v274_v7 }
 0x146   :  { %v380_v12 = vsel %vm379_vm6, %v677_v60, %v376_v8 }
 0x147   :  { %v279_v11 = vsel %vm278_vm8, %v679_v61, %v275_v9  ;;  %v381_v16 = vmul.f32 %v380_v12, %v869_v36 }
 0x148   :  { %v280_v14 = vmul.f32 %v279_v11, %v867_v34 }
 0x14a   :  { %v281_v15 = vadd.f32 %v280_v14, %v180_v13 }
 0x14c   :  { %v382_v17 = vadd.f32 %v381_v16, %v281_v15 }
 0x14e   :  { %v383_v18 = vmul.f32 0.33333334, %v382_v17 }
 0x150   :  { %v384_v19 = vmax.f32 %v383_v18, 0.0 }
 0x152   :  { %v385_v20 = vpack.c.bf16 %v384_v19, %v384_v19 }
 0x154   :  { %462 = vmatmul.bf16.vlgmr.msra.gmra.mxu3 %v385_v20 }
 0x1d7   :  { %v463_v24 = vpop.f32.mrf.mxu3 }
 0x1d8   :  { %v464_v25 = vadd.f32 %v673_v23, %v463_v24 }
 0x1da   :  { %v470_v26 = vsel %vm469_vm9, %v464_v25, -1e+30 }
 0x1db   :  { %471 = vmax.xlane.f32.xlu1 %v470_v26 }
 0x1df   :  { %v465_v27 = vpop.f32.mrf.mxu3 }
 0x24e   :  { %v472_v28 = vpop.xlane.xlu1 %471 }
 0x24f   :  { %v473_v29 = vsub.f32 %v470_v26, %v472_v28 }
 0x251   :  { %v474_v30 = vmul.f32 1.442695, %v473_v29 }
 0x253   :  { %680 = vpow2.f32 %v474_v30 }
 0x259   :  { %v681_v31 = vpop.eup %680 }
 0x25a   :  { %476 = vadd.xlane.f32.xlu2 %v681_v31 }
 0x2cd   :  { %v477_v32 = vpop.xlane.xlu2 %476 }
 0x2ce   :  { %682 = vlog2.f32 %v477_v32 }
 0x2d4   :  { %v683_v33 = vpop.eup %682 }
 0x2d5   :  { %v479_v34 = vmul.f32 0.6931472, %v683_v33 }
 0x2d7   :  { %v480_v35 = vsub.f32 %v473_v29, %v479_v34 }
 0x2d9   :  { %481 = vst [vmem:[#allocation10] sm:$0xff] %v480_v35 }
 0x2da   :  { %492 = dma.vmem_to_hbm [thread:$0]  %s488_s16, 128, %s490_s4, [#allocation4]  }
 0x2db   :  { %810 = dma.done.wait [#allocation4], 128  }
 0x2dc   :  { %811 = vsyncadd [#allocation4], 4294967168 }
 0x2dd   :  { %497 = vsyncpa [#allocation3], 1 }
 0x2de   :  { %498 = vsyncpa [#allocation6], 1 }
 0x2df   :  { %499 = vsyncpa [#allocation9], 1 }
 0x2e0   :  { %500 = vsyncpa [#allocation4], 1 }

</bundles_post_ra>
